<compile_context>
chip_gen: v7x
topology: tpu7x:2x2x1
jax: 0.10.0
libtpu: 0.0.40
codegen_flags: <defaults>
</compile_context>

<pallas_src>
import jax
import jax.numpy as jnp
from jax.experimental import pallas as pl
from jax.experimental.pallas import tpu as pltpu


def _round_up(x, m):
    return ((x + m - 1) // m) * m


def _fused_ac_kernel(state_ref, w1_ref, b1_ref, w2_ref, b2_ref,
                     value_ref, policy_ref):
    x = state_ref[...]                                                 # [TB, D] f32

    # Fused first layer (critic_l1 | actor_l1) + ReLU.
    h = jnp.dot(x, w1_ref[...], preferred_element_type=jnp.float32) + b1_ref[...]
    h = jnp.maximum(h, 0.0)                                            # [TB, 2H]

    # Fused block-diagonal second layer -> [TB, 1+A]
    # (col 0 = critic value, cols 1..A = actor logits; off-blocks are exact 0).
    y = jnp.dot(h, w2_ref[...], preferred_element_type=jnp.float32) + b2_ref[...]

    value_ref[...] = y[:, 0:1].astype(value_ref.dtype)                 # [TB, 1]

    # Numerically stable softmax over the action logits (f32).
    logits = y[:, 1:]                                                  # [TB, A]
    m = jnp.max(logits, axis=-1, keepdims=True)
    e = jnp.exp(logits - m)
    denom = jnp.sum(e, axis=-1, keepdims=True)
    # Approximate reciprocal on the EUP + Newton-Raphson refinement on the VPU.
    # (Two NR steps on a [TB,1] column cost 4 trivial VPU ops and guarantee
    #  f32-level accuracy regardless of the EUP seed precision.)
    r = pl.reciprocal(denom, approx=True)
    r = r * (2.0 - denom * r)
    r = r * (2.0 - denom * r)
    policy_ref[...] = (e * r).astype(policy_ref.dtype)                 # [TB, A]


def pack_params(params):
    """Fuse the 4 Linear layers into 2 fused, pre-transposed [in, out] layers.

    Call ONCE per weight update in the PPO loop (hoisted out of the per-step
    forward path) and reuse the result across rollout steps.
    """
    d, h = params["wc1"].shape
    a = params["wa2"].shape[1]

    w1 = jnp.concatenate([params["wc1"], params["wa1"]], axis=1)       # [D, 2H]
    b1 = jnp.concatenate([params["bc1"], params["ba1"]], axis=1)       # [1, 2H]

    # Block-diagonal second layer; off-blocks are exact zeros so the two heads
    # cannot leak into each other.
    w2 = jnp.zeros((2 * h, 1 + a), jnp.float32)
    w2 = w2.at[:h, 0:1].set(params["wc2"])                             # critic col
    w2 = w2.at[h:, 1:].set(params["wa2"])                              # actor cols
    b2 = jnp.zeros((1, 1 + a), jnp.float32)
    b2 = b2.at[:, 0:1].set(params["bc2"])
    b2 = b2.at[:, 1:].set(params["ba2"])
    return dict(w1=w1, b1=b1, w2=w2, b2=b2)


_TB_MAX = 2048        # rows per grid step: amortizes ~0.35us/step overhead and
                      # still fits v5e's 16 MiB default scoped VMEM double-buffered.
_MIN_CORE_ROWS = 512  # don't split tiny batches across TensorCores.


@jax.jit
def actor_critic_forward(state, packed):
    """state: [B, num_inputs] f32.  packed: output of pack_params()."""
    B, D = state.shape
    H2 = packed["w1"].shape[1]          # 2 * hidden_size
    A = packed["w2"].shape[1] - 1       # num_actions

    # Balanced batch tiling: enough grid steps to (a) cap the tile at _TB_MAX and
    # (b) give both v7x TensorCores work when the batch is large enough to split,
    # while keeping tail padding under one sublane group.
    n_steps = pl.cdiv(B, _TB_MAX)
    if B >= 2 * _MIN_CORE_ROWS:
        n_steps = max(n_steps, 2)
    TB = _round_up(pl.cdiv(B, n_steps), 8)
    n_steps = pl.cdiv(B, TB)
    B_pad = n_steps * TB
    if B_pad != B:
        state = jnp.pad(state, ((0, B_pad - B), (0, 0)))

    value, policy = pl.pallas_call(
        _fused_ac_kernel,
        out_shape=(jax.ShapeDtypeStruct((B_pad, 1), jnp.float32),
                   jax.ShapeDtypeStruct((B_pad, A), jnp.float32)),
        grid=(n_steps,),
        in_specs=[
            pl.BlockSpec((TB, D), lambda i: (i, 0)),         # streamed batch tile
            # Resident fused weights/biases (constant block index -> no re-DMA).
            # TODO(synk): single-buffer these via pipeline_mode=pl.Buffered(1) to
            # reclaim VMEM at realistic H; at H=32 the extra buffer is ~10 KiB.
            pl.BlockSpec((D, H2), lambda i: (0, 0)),
            pl.BlockSpec((1, H2), lambda i: (0, 0)),
            pl.BlockSpec((H2, A + 1), lambda i: (0, 0)),
            pl.BlockSpec((1, A + 1), lambda i: (0, 0)),
        ],
        out_specs=(pl.BlockSpec((TB, 1), lambda i: (i, 0)),  # narrow value rows
                   pl.BlockSpec((TB, A), lambda i: (i, 0))), # narrow policy rows
        compiler_params=pltpu.CompilerParams(
            dimension_semantics=("parallel",)),              # batch shards across TCs
    )(state, packed["w1"], packed["b1"], packed["w2"], packed["b2"])

    if B_pad != B:
        value, policy = value[:B], policy[:B]
    return value, policy


def init_params(key, num_inputs, num_actions, hidden_size):
    """Deterministic synthetic init (uniform, PyTorch-Linear-like bounds).
    Weights stored pre-transposed as [in_features, out_features]."""
    ks = jax.random.split(key, 8)

    def linear(kw, kb, fan_in, fan_out):
        bound = 1.0 / jnp.sqrt(jnp.float32(fan_in))
        w = jax.random.uniform(kw, (fan_in, fan_out), jnp.float32, -bound, bound)
        b = jax.random.uniform(kb, (1, fan_out), jnp.float32, -bound, bound)
        return w, b

    wc1, bc1 = linear(ks[0], ks[1], num_inputs, hidden_size)
    wc2, bc2 = linear(ks[2], ks[3], hidden_size, 1)
    wa1, ba1 = linear(ks[4], ks[5], num_inputs, hidden_size)
    wa2, ba2 = linear(ks[6], ks[7], hidden_size, num_actions)
    return dict(wc1=wc1, bc1=bc1, wc2=wc2, bc2=bc2,
                wa1=wa1, ba1=ba1, wa2=wa2, ba2=ba2)


def _reference(state, p):
    h_c = jnp.maximum(state @ p["wc1"] + p["bc1"], 0.0)
    value = h_c @ p["wc2"] + p["bc2"]
    h_a = jnp.maximum(state @ p["wa1"] + p["ba1"], 0.0)
    logits = h_a @ p["wa2"] + p["ba2"]
    return value, jax.nn.softmax(logits, axis=-1)


if __name__ == "__main__":
    B, num_inputs, num_actions, hidden_size = 8, 32, 4, 32

    key = jax.random.PRNGKey(0)
    k_state, k_params = jax.random.split(key)
    state = jax.random.normal(k_state, (B, num_inputs), jnp.float32)
    params = init_params(k_params, num_inputs, num_actions, hidden_size)

    # Pack once (per weight update), reuse across forward passes.
    packed = pack_params(params)

    value, policy = actor_critic_forward(state, packed)
    jax.block_until_ready((value, policy))

    v_ref, p_ref = _reference(state, params)
    assert value.shape == (B, 1) and policy.shape == (B, num_actions)
    assert jnp.allclose(value, v_ref, atol=1e-5, rtol=1e-5)
    assert jnp.allclose(policy, p_ref, atol=1e-5, rtol=1e-5)
    assert jnp.allclose(jnp.sum(policy, axis=-1), 1.0, atol=1e-5)

    print("KERNEL_OK")
</pallas_src>

<mosaic_0001>
module attributes {stable_mosaic.version = 11 : i64} {
  func.func @_fused_ac_kernel(%arg0: i32, %arg1: memref<8x32xf32, #tpu.memory_space<vmem>>, %arg2: memref<32x64xf32, #tpu.memory_space<vmem>>, %arg3: memref<1x64xf32, #tpu.memory_space<vmem>>, %arg4: memref<64x5xf32, #tpu.memory_space<vmem>>, %arg5: memref<1x5xf32, #tpu.memory_space<vmem>>, %arg6: memref<8x1xf32, #tpu.memory_space<vmem>>, %arg7: memref<8x4xf32, #tpu.memory_space<vmem>>) attributes {dimension_semantics = [#tpu.dimension_semantics<parallel>], iteration_bounds = array<i64: 1>, scalar_prefetch = 0 : i64, scratch_operands = 0 : i64, tpu.core_type = #tpu.core_type<tc>, window_params = [{transform_indices = @transform_0, window_bounds = array<i64: 8, 32>}, {pipeline_mode = #tpu.pipeline_mode<synchronous>, transform_indices = @transform_1, window_bounds = array<i64: 32, 64>}, {pipeline_mode = #tpu.pipeline_mode<synchronous>, transform_indices = @transform_2, window_bounds = array<i64: 1, 64>}, {pipeline_mode = #tpu.pipeline_mode<synchronous>, transform_indices = @transform_3, window_bounds = array<i64: 64, 5>}, {pipeline_mode = #tpu.pipeline_mode<synchronous>, transform_indices = @transform_4, window_bounds = array<i64: 1, 5>}, {transform_indices = @transform_5, window_bounds = array<i64: 8, 1>}, {transform_indices = @transform_6, window_bounds = array<i64: 8, 4>}]} {
    %c0 = arith.constant 0 : index
    %c0_0 = arith.constant 0 : index
    %0 = vector.load %arg1[%c0, %c0_0] : memref<8x32xf32, #tpu.memory_space<vmem>>, vector<8x32xf32>
    %c0_1 = arith.constant 0 : index
    %c0_2 = arith.constant 0 : index
    %1 = vector.load %arg2[%c0_1, %c0_2] : memref<32x64xf32, #tpu.memory_space<vmem>>, vector<32x64xf32>
    %cst = arith.constant dense<0.000000e+00> : vector<8x64xf32>
    %2 = tpu.matmul %0, %1, %cst {dimension_numbers = #tpu.dot_dimension_numbers<[1], [0], [0], [1], [0, 0, 1, 1], [], []>} : vector<8x32xf32>, vector<32x64xf32>, vector<8x64xf32> -> vector<8x64xf32>
    %c0_3 = arith.constant 0 : index
    %c0_4 = arith.constant 0 : index
    %3 = vector.load %arg3[%c0_3, %c0_4] : memref<1x64xf32, #tpu.memory_space<vmem>>, vector<1x64xf32>
    %4 = vector.broadcast %3 : vector<1x64xf32> to vector<8x64xf32>
    %5 = arith.addf %2, %4 : vector<8x64xf32>
    %cst_5 = arith.constant 0.000000e+00 : f32
    %6 = vector.broadcast %cst_5 : f32 to vector<8x64xf32>
    %7 = arith.maximumf %5, %6 : vector<8x64xf32>
    %c0_6 = arith.constant 0 : index
    %c0_7 = arith.constant 0 : index
    %8 = vector.load %arg4[%c0_6, %c0_7] : memref<64x5xf32, #tpu.memory_space<vmem>>, vector<64x5xf32>
    %cst_8 = arith.constant dense<0.000000e+00> : vector<8x5xf32>
    %9 = tpu.matmul %7, %8, %cst_8 {dimension_numbers = #tpu.dot_dimension_numbers<[1], [0], [0], [1], [0, 0, 1, 1], [], []>} : vector<8x64xf32>, vector<64x5xf32>, vector<8x5xf32> -> vector<8x5xf32>
    %c0_9 = arith.constant 0 : index
    %c0_10 = arith.constant 0 : index
    %10 = vector.load %arg5[%c0_9, %c0_10] : memref<1x5xf32, #tpu.memory_space<vmem>>, vector<1x5xf32>
    %11 = vector.broadcast %10 : vector<1x5xf32> to vector<8x5xf32>
    %12 = arith.addf %9, %11 : vector<8x5xf32>
    %13 = vector.extract_strided_slice %12 {offsets = [0, 0], sizes = [8, 1], strides = [1, 1]} : vector<8x5xf32> to vector<8x1xf32>
    %c0_11 = arith.constant 0 : index
    %c0_12 = arith.constant 0 : index
    %14 = vector.load %arg6[%c0_11, %c0_12] : memref<8x1xf32, #tpu.memory_space<vmem>>, vector<8x1xf32>
    tpu.vector_store %arg6[%c0_11, %c0_12], %13 {strides = array<i32>} : memref<8x1xf32, #tpu.memory_space<vmem>>, vector<8x1xf32>,
    %15 = vector.extract_strided_slice %12 {offsets = [0, 1], sizes = [8, 4], strides = [1, 1]} : vector<8x5xf32> to vector<8x4xf32>
    %cst_13 = arith.constant dense<0xFF800000> : vector<8xf32>
    %16 = vector.multi_reduction <maximumf>, %15, %cst_13 [1] : vector<8x4xf32> to vector<8xf32>
    %17 = vector.shape_cast %16 : vector<8xf32> to vector<8x1xf32>
    %18 = vector.broadcast %17 : vector<8x1xf32> to vector<8x4xf32>
    %19 = arith.subf %15, %18 : vector<8x4xf32>
    %20 = math.exp %19 : vector<8x4xf32>
    %cst_14 = arith.constant dense<0.000000e+00> : vector<8xf32>
    %21 = vector.multi_reduction <add>, %20, %cst_14 [1] : vector<8x4xf32> to vector<8xf32>
    %22 = vector.shape_cast %21 : vector<8xf32> to vector<8x1xf32>
    %23 = tpu.reciprocal %22 {approx = true} : vector<8x1xf32> -> vector<8x1xf32>
    %24 = arith.mulf %22, %23 : vector<8x1xf32>
    %cst_15 = arith.constant 2.000000e+00 : f32
    %25 = vector.broadcast %cst_15 : f32 to vector<8x1xf32>
    %26 = arith.subf %25, %24 : vector<8x1xf32>
    %27 = arith.mulf %23, %26 : vector<8x1xf32>
    %28 = arith.mulf %22, %27 : vector<8x1xf32>
    %cst_16 = arith.constant 2.000000e+00 : f32
    %29 = vector.broadcast %cst_16 : f32 to vector<8x1xf32>
    %30 = arith.subf %29, %28 : vector<8x1xf32>
    %31 = arith.mulf %27, %30 : vector<8x1xf32>
    %32 = vector.broadcast %31 : vector<8x1xf32> to vector<8x4xf32>
    %33 = arith.mulf %20, %32 : vector<8x4xf32>
    %c0_17 = arith.constant 0 : index
    %c0_18 = arith.constant 0 : index
    %34 = vector.load %arg7[%c0_17, %c0_18] : memref<8x4xf32, #tpu.memory_space<vmem>>, vector<8x4xf32>
    tpu.vector_store %arg7[%c0_17, %c0_18], %33 {strides = array<i32>} : memref<8x4xf32, #tpu.memory_space<vmem>>, vector<8x4xf32>,
    return
  }
  func.func @transform_0(%arg0: i32) -> (i32, i32) {
    %c0_i32 = arith.constant 0 : i32
    %c0_i32_0 = arith.constant 0 : i32
    return %arg0, %c0_i32 : i32, i32
  }
  func.func @transform_1(%arg0: i32) -> (i32, i32) {
    %c0_i32 = arith.constant 0 : i32
    %c0_i32_0 = arith.constant 0 : i32
    %c0_i32_1 = arith.constant 0 : i32
    return %c0_i32, %c0_i32_0 : i32, i32
  }
  func.func @transform_2(%arg0: i32) -> (i32, i32) {
    %c0_i32 = arith.constant 0 : i32
    %c0_i32_0 = arith.constant 0 : i32
    %c0_i32_1 = arith.constant 0 : i32
    return %c0_i32, %c0_i32_0 : i32, i32
  }
  func.func @transform_3(%arg0: i32) -> (i32, i32) {
    %c0_i32 = arith.constant 0 : i32
    %c0_i32_0 = arith.constant 0 : i32
    %c0_i32_1 = arith.constant 0 : i32
    return %c0_i32, %c0_i32_0 : i32, i32
  }
  func.func @transform_4(%arg0: i32) -> (i32, i32) {
    %c0_i32 = arith.constant 0 : i32
    %c0_i32_0 = arith.constant 0 : i32
    %c0_i32_1 = arith.constant 0 : i32
    return %c0_i32, %c0_i32_0 : i32, i32
  }
  func.func @transform_5(%arg0: i32) -> (i32, i32) {
    %c0_i32 = arith.constant 0 : i32
    %c0_i32_0 = arith.constant 0 : i32
    return %arg0, %c0_i32 : i32, i32
  }
  func.func @transform_6(%arg0: i32) -> (i32, i32) {
    %c0_i32 = arith.constant 0 : i32
    %c0_i32_0 = arith.constant 0 : i32
    return %arg0, %c0_i32 : i32, i32
  }
}

</mosaic_0001>

<bundles_post_ra>
// kernel: actor_critic_forward.1
= control target key start
LH: loop header
LB: loop body
LE: loop exit
PB: predicated region body
PF: predicated region fallthrough
CT: control target
= control target key end

     0   :  { %v310_v0 = vmov 0.0|0.0   ;;  %vm311_vm0 = vmmov 0   ;;  %v312_v4 = vmov 0.0   ;;  %vm34_vm1 = vcmask 261120   ;;  %s402_s1 = inlined_call_operand.vmem [shape: f32[32,64], index: 1, kind: input, shape index: {}]   ;;  %s403_s3 = inlined_call_operand.vmem [shape: f32[64,5], index: 3, kind: input, shape index: {}]   ;;  %s404_s0 = inlined_call_operand.vmem [shape: f32[8,32], index: 0, kind: input, shape index: {}]   ;;  %s405_s2 = inlined_call_operand.vmem [shape: f32[1,64], index: 2, kind: input, shape index: {}]   ;;  %s406_s4 = inlined_call_operand.vmem [shape: f32[1,5], index: 4, kind: input, shape index: {}]   ;;  %s407_s5 = inlined_call_operand.vmem [shape: f32[8,1], index: 5, kind: output, shape index: {0}]   ;;  %s408_s6 = inlined_call_operand.vmem [shape: f32[8,4], index: 6, kind: output, shape index: {1}]  }
   0x1   :  { %284 = vmatprep.subr.bf16.mxu0 %v310_v0  ;;  %v23_v1 = vld [vmem:[%s402_s1] sm:$0xff]  ;;  %v24_v2 = vld [vmem:[%s402_s1 + $0x8] sm:$0xff]  ;;  %v25_v3 = vld [vmem:[%s402_s1 + $0x10] sm:$0xff]  ;;  %262 = vmatprep.mubr.msk.f32.mxu0 %vm311_vm0, %v312_v4  ;;  %vm124_vm2 = vcmask 523264   ;;  %vm198_vm3 = vcmask 7168   ;;  %vm200_vm4 = vcmask 39944  }
   0x2   :  { %v285_v5 = vpack.c.bf16 %v24_v2, %v23_v1  ;;  %v26_v6 = vld [vmem:[%s402_s1 + $0x18] sm:$0xff]  ;;  %290 = vmatprep.subr.bf16.mxu1 %v310_v0  ;;  %v109_v7 = vld [vmem:[%s403_s3] sm:$0xff]  ;;  %281 = vmatprep.mubr.msk.f32.mxu1 %vm311_vm0, %v312_v4  ;;  %v110_v8 = vld [vmem:[%s403_s3 + $0x8] sm:$0xff]  ;;  %vm211_vm5 = vcmask 31744  }
   0x3   :  { %v111_v9 = vld [vmem:[%s403_s3 + $0x10] sm:$0xff]  ;;  %v112_v10 = vld [vmem:[%s403_s3 + $0x18] sm:$0xff]  ;;  %v288_v11 = vpack.c.bf16 %v26_v6, %v25_v3  ;;  %v291_v12 = vpack.c.bf16 %v110_v8, %v109_v7  ;;  %v113_v14 = vld [vmem:[%s403_s3 + $0x20] sm:$0xff] }
   0x4   :  { %286 = vmatpush3.bf16.msra.mxu0 %v285_v5  ;;  %v294_v13 = vpack.c.bf16 %v112_v10, %v111_v9  ;;  %v114_v15 = vld [vmem:[%s403_s3 + $0x28] sm:$0xff]  ;;  %v22_v16 = vld [vmem:[%s404_s0] sm:$0xff]  ;;  %v115_v18 = vld [vmem:[%s403_s3 + $0x30] sm:$0xff] }
   0x5   :  { %287 = vmatprep.subr.bf16.mxu0 %v310_v0  ;;  %292 = vmatpush3.bf16.msra.mxu1 %v291_v12  ;;  %v297_v17 = vpack.c.bf16 %v114_v15, %v113_v14  ;;  %v116_v19 = vld [vmem:[%s403_s3 + $0x38] sm:$0xff]  ;;  %v236_v21 = vld [vmem:[%s405_s2] ss:$0 sm:$0xff]  ;;  %s313_s2 = smov 127  }
   0x6   :  { %293 = vmatprep.subr.bf16.mxu1 %v310_v0  ;;  %v300_v20 = vpack.c.bf16 %v116_v19, %v115_v18  ;;  %v238_v26 = vld [vmem:[%s406_s4] ss:$0 sm:$0xff] }
   0x8   :  { %289 = vmatpush3.bf16.msra.mxu0 %v288_v11 }
   0x9   :  { %295 = vmatpush3.bf16.msra.mxu1 %v294_v13 }
   0xa   :  { %296 = vmatprep.subr.bf16.mxu1 %v310_v0 }
   0xb   :  { %263 = vmatmul.mubr.msk.f32.vlgmr.msra.gmra.mrb[0].mxu0 %vm34_vm1, %v22_v16 }
   0xd   :  { %298 = vmatpush3.bf16.msra.mxu1 %v297_v17 }
   0xe   :  { %299 = vmatprep.subr.bf16.mxu1 %v310_v0 }
  0x11   :  { %301 = vmatpush3.bf16.msra.mxu1 %v300_v20 }
  0xde   :  { %v104_v22 = vpop.f32.mrb[0].mxu0 }
  0xdf   :  { %v105_v23 = vadd.f32 %v236_v21, %v104_v22  ;;  %v264_v24 = vpop.f32.mrb[1].mxu0 }
  0xe1   :  { %v108_v25 = vmax.f32 %v105_v23, 0.0 }
  0xe3   :  { %282 = vmatmul.mubr.msk.f32.vlgmr.msra.gmra.mrb[0].mxu1 %vm124_vm2, %v108_v25 }
 0x1b6   :  { %v194_v27 = vpop.f32.mrb[0].mxu1 }
 0x1b7   :  { %v195_v28 = vadd.f32 %v238_v26, %v194_v27  ;;  %v283_v29 = vpop.f32.mrb[1].mxu1 }
 0x1b9   :  { %199 = vst.msk [vmem:[%s407_s5] sm:$0xff] %vm198_vm3, %v195_v28  ;;  %v201_v30 = vsel %vm200_vm4, %v195_v28, -inf }
 0x1ba   :  { %202 = vmax.xlane.f32.xlu0 %v201_v30 }
 0x247   :  { %v203_v31 = vpop.xlane.xlu0 %202 }
 0x248   :  { %v204_v32 = vsub.f32 %v195_v28, %v203_v31 }
 0x24a   :  { %v205_v33 = vmul.f32 1.442695, %v204_v32 }
 0x24c   :  { %306 = vpow2.f32 %v205_v33 }
 0x256   :  { %v307_v34 = vpop.eup %306 }
 0x257   :  { %208 = vrot.lane.b32.xlu0 %v307_v34, %s313_s2 }
 0x2c9   :  { %v209_v35 = vpop.permute.xlu0 %208 }
 0x2ca   :  { %v212_v36 = vsel %vm211_vm5, %v209_v35, 0.0 }
 0x2cb   :  { %213 = vadd.xlane.f32.xlu1 %v212_v36 }
 0x358   :  { %v214_v37 = vpop.xlane.xlu1 %213 }
 0x359   :  { %308 = vrcp.f32 %v214_v37 }
 0x363   :  { %v309_v38 = vpop.eup %308 }
 0x364   :  { %v216_v39 = vmul.f32 %v309_v38, %v214_v37 }
 0x366   :  { %v217_v40 = vsub.f32 2.0, %v216_v39 }
 0x368   :  { %v218_v41 = vmul.f32 %v309_v38, %v217_v40 }
 0x36a   :  { %v219_v42 = vmul.f32 %v218_v41, %v214_v37 }
 0x36c   :  { %v220_v43 = vsub.f32 2.0, %v219_v42 }
 0x36e   :  { %v221_v44 = vmul.f32 %v220_v43, %v218_v41 }
 0x370   :  { %v222_v45 = vmul.f32 %v307_v34, %v221_v44 }
 0x372   :  { %224 = vrot.lane.b32.xlu1 %v222_v45, %s313_s2 }
 0x3e4   :  { %v225_v46 = vpop.permute.xlu1 %224 }
 0x3e5   :  { %227 = vst.msk [vmem:[%s408_s6] sm:$0xff] %vm211_vm5, %v225_v46 }

</bundles_post_ra>
